<compile_context>
chip_gen: v6e
topology: v6e:2x2x1
jax: 0.10.0
libtpu: 0.0.40
codegen_flags: <defaults>
</compile_context>

<pallas_src>
import jax
import jax.numpy as jnp
from jax.experimental import pallas as pl
from jax.experimental.pallas import tpu as pltpu

LN_EPS = 1e-5


def _make_embedding_kernel(true_d, split_output, cast_lhs_bf16):
    """Build the kernel body with static configuration baked in."""
    inv_d = 1.0 / float(true_d)

    def kernel(x_ref, w_ref, pc_ref, pp_ref, pos_ref, *out_refs):
        # x_ref:   (TM, H)   bert embeddings tile (f32 or bf16)
        # w_ref:   (H, DC)   bert_proj weight, (in x out) layout, resident
        # pc_ref:  (8, DC)   row0 = bert_proj bias, row1 = gamma[:DC], row2 = beta[:DC]
        # pp_ref:  (8, DP)   row0 = gamma[DC:],     row1 = beta[DC:]
        # pos_ref: (TM, DP)  positional embedding tile (shared across batch)
        # out_refs: either ((TM, D),) or ((TM, DC), (TM, DP)) when split_output
        x = x_ref[...]
        if cast_lhs_bf16:
            # Cast in-kernel: x stays f32 in HBM (no wrapper astype pass), MXU runs bf16.
            x = x.astype(jnp.bfloat16)
        content = jnp.dot(x, w_ref[...], preferred_element_type=jnp.float32)
        content = content + pc_ref[0:1, :]
        pos = pos_ref[...].astype(jnp.float32)

        dc = content.shape[-1]

        # LayerNorm over the (virtual) concatenation [content | pos].
        # Two-pass style: center first, then sum the squares of the centered values
        # (the centered values are reused for the affine output, so stability is free).
        mean = (jnp.sum(content, axis=-1, keepdims=True)
                + jnp.sum(pos, axis=-1, keepdims=True)) * inv_d
        c_c = content - mean
        c_p = pos - mean
        var = (jnp.sum(c_c * c_c, axis=-1, keepdims=True)
               + jnp.sum(c_p * c_p, axis=-1, keepdims=True)) * inv_d
        inv_std = jax.lax.rsqrt(var + LN_EPS)

        content_n = c_c * inv_std * pc_ref[1:2, :] + pc_ref[2:3, :]
        pos_n = c_p * inv_std * pp_ref[0:1, :] + pp_ref[1:2, :]

        if split_output:
            # Two separate outputs, each starting at lane 0 -> dense stores for any DC.
            outc_ref, outp_ref = out_refs
            outc_ref[...] = content_n.astype(outc_ref.dtype)
            outp_ref[...] = pos_n.astype(outp_ref.dtype)
        else:
            # Single (TM, D) output; when DC % 128 == 0 both halves are lane-aligned
            # dense stores (the common d_model=1024 case).
            out_ref, = out_refs
            out_ref[:, :dc] = content_n.astype(out_ref.dtype)
            out_ref[:, dc:] = pos_n.astype(out_ref.dtype)

    return kernel


def _pick_row_tile(seq_len, *, sublane=8, lo=256, target=512):
    """Row tile: full S when small; else a sublane-multiple divisor in [lo, target];
    else a non-dividing sublane-multiple tile (grid uses cdiv, last block padded)."""
    if seq_len <= target:
        return seq_len                      # block == full dim satisfies the layout rule
    hi = target - target % sublane
    for cand in range(hi, lo - 1, -sublane):
        if seq_len % cand == 0:
            return cand
    return hi


def embedding_layer_forward(bert_embeddings, w_proj, b_proj, pos_emb, gamma, beta,
                            *, row_tile=512, use_bf16_matmul=False,
                            out_dtype=jnp.float32, x_buffers=2, split_output=False):
    """bert_embeddings: (B, S, H); w_proj: (H, DC); pos_emb: (S, DP).

    Returns (LayerNorm(concat([x @ w + b, pos])) as (B,S,D)  -- or as a
    ((B,S,DC), (B,S,DP)) pair when split_output=True -- , snts_mask).
    """
    B, S, H = bert_embeddings.shape
    DC = w_proj.shape[1]
    DP = pos_emb.shape[1]
    D = DC + DP
    assert gamma.shape == (D,) and beta.shape == (D,)
    assert pos_emb.shape[0] == S

    # Never astype x in the wrapper (that is an extra, un-hidden HBM pass).
    x = bert_embeddings
    w = w_proj.astype(jnp.bfloat16) if use_bf16_matmul else w_proj
    cast_lhs_bf16 = bool(use_bf16_matmul) and x.dtype != jnp.bfloat16

    sublane = 16 if x.dtype == jnp.bfloat16 else 8   # bf16 tiles want TM % 16 == 0
    TM = _pick_row_tile(S, sublane=sublane, target=row_tile)
    num_s_tiles = pl.cdiv(S, TM)
    # v7x has 2 TensorCores: make sure the "parallel" grid exposes >= 2 steps.
    if num_s_tiles * B < 2 and S >= 2 * sublane:
        TM = -(-((S + 1) // 2) // sublane) * sublane
        num_s_tiles = pl.cdiv(S, TM)

    # Tiny resident params fused into two slabs (two one-time DMAs instead of five).
    param_c = jnp.zeros((8, DC), jnp.float32)
    param_c = param_c.at[0].set(b_proj).at[1].set(gamma[:DC]).at[2].set(beta[:DC])
    param_p = jnp.zeros((8, DP), jnp.float32)
    param_p = param_p.at[0].set(gamma[DC:]).at[1].set(beta[DC:])

    kernel = _make_embedding_kernel(D, split_output, cast_lhs_bf16)

    # x tile spec, optionally >2-deep pipelined (useful on v7x when DMA is exposed).
    if x_buffers and int(x_buffers) > 2:
        x_spec = pl.BlockSpec((None, TM, H), lambda s, b: (b, s, 0),
                              pipeline_mode=pl.Buffered(int(x_buffers)))
    else:
        x_spec = pl.BlockSpec((None, TM, H), lambda s, b: (b, s, 0))

    if split_output:
        out_shape = (jax.ShapeDtypeStruct((B, S, DC), out_dtype),
                     jax.ShapeDtypeStruct((B, S, DP), out_dtype))
        out_specs = (pl.BlockSpec((None, TM, DC), lambda s, b: (b, s, 0)),
                     pl.BlockSpec((None, TM, DP), lambda s, b: (b, s, 0)))
    else:
        out_shape = jax.ShapeDtypeStruct((B, S, D), out_dtype)
        out_specs = pl.BlockSpec((None, TM, D), lambda s, b: (b, s, 0))

    # VMEM request: actual double-buffered need (per-array element sizes, lane/sublane
    # padded) plus ~30% headroom and a little compiler scratch; no arbitrary floor/ceiling.
    pad = lambda v, m: -(-v // m) * m
    TMp = pad(TM, 16)
    Hp, DCp, DPp, Dp = pad(H, 128), pad(DC, 128), pad(DP, 128), pad(D, 128)
    x_elt = jnp.dtype(x.dtype).itemsize
    w_elt = jnp.dtype(w.dtype).itemsize
    o_elt = jnp.dtype(out_dtype).itemsize
    out_cols = (DCp + DPp) if split_output else Dp
    need = (max(2, int(x_buffers)) * TMp * Hp * x_elt      # x tile buffers
            + 2 * Hp * DCp * w_elt                         # resident weight
            + 2 * TMp * DPp * 4                            # positional tile
            + 2 * 8 * (DCp + DPp) * 4                      # fused param slabs
            + 2 * TMp * out_cols * o_elt)                  # output tile(s)
    vmem_limit = int(need * 1.3) + (4 << 20)

    cost = pl.CostEstimate(
        flops=2 * B * S * H * DC,
        transcendentals=B * S,                             # one rsqrt per row
        bytes_accessed=(B * S * H * x_elt + H * DC * w_elt + S * DP * 4
                        + 8 * (DC + DP) * 4 + B * S * D * o_elt),
    )

    out = pl.pallas_call(
        kernel,
        out_shape=out_shape,
        # Seq-tile axis outer, batch inner: the positional tile's block index is
        # constant across the inner batch loop, so it is not re-fetched per batch
        # (no Bx HBM broadcast of the positional table).
        grid=(num_s_tiles, B),
        in_specs=[
            x_spec,                                                  # x tile
            pl.BlockSpec((H, DC), lambda s, b: (0, 0)),              # weight (resident)
            pl.BlockSpec((8, DC), lambda s, b: (0, 0)),              # bias/gamma/beta (content)
            pl.BlockSpec((8, DP), lambda s, b: (0, 0)),              # gamma/beta (position)
            pl.BlockSpec((TM, DP), lambda s, b: (s, 0)),             # pos tile (no B broadcast)
        ],
        out_specs=out_specs,
        compiler_params=pltpu.CompilerParams(
            dimension_semantics=("parallel", "parallel"),
            vmem_limit_bytes=vmem_limit,
        ),
        cost_estimate=cost,
    )(x, w, param_c, param_p, pos_emb)

    # TODO(synk): snts_mask comes from WordPiece tokenization of raw strings (no
    # Pallas equivalent); synthetic all-ones mask here.
    snts_mask = jnp.ones((B, S), dtype=jnp.int32)
    return out, snts_mask


def _reference(bert_embeddings, w_proj, b_proj, pos_emb, gamma, beta):
    content = jnp.einsum("bsh,hc->bsc", bert_embeddings, w_proj) + b_proj
    B = bert_embeddings.shape[0]
    pos = jnp.broadcast_to(pos_emb[None], (B,) + pos_emb.shape)
    emb = jnp.concatenate([content, pos], axis=-1)
    mean = jnp.mean(emb, axis=-1, keepdims=True)
    var = jnp.mean((emb - mean) ** 2, axis=-1, keepdims=True)
    return (emb - mean) / jnp.sqrt(var + LN_EPS) * gamma + beta


if __name__ == "__main__":
    # Small, module-consistent shapes:
    #   batch=2, seq=8 (word-aligned tokens), bert_hidden=32, d_model=32,
    #   partition=True -> d_content=16, d_position=16.
    B, S, H, D = 2, 8, 32, 32
    DC = D // 2          # d_content
    DP = D - D // 2      # d_position

    key = jax.random.PRNGKey(0)
    k_x, k_w, k_b, k_p, k_g, k_be = jax.random.split(key, 6)

    bert_embeddings = jax.random.normal(k_x, (B, S, H), dtype=jnp.float32)
    w_proj = jax.random.normal(k_w, (H, DC), dtype=jnp.float32) * 0.05   # bert_proj.weight.T
    b_proj = jax.random.normal(k_b, (DC,), dtype=jnp.float32) * 0.05     # bert_proj.bias
    pos_emb = jax.random.normal(k_p, (S, DP), dtype=jnp.float32) * 0.02  # LearnedPositionalEmbedding[:S]
    gamma = 1.0 + 0.1 * jax.random.normal(k_g, (D,), dtype=jnp.float32)  # layer_norm.weight
    beta = 0.1 * jax.random.normal(k_be, (D,), dtype=jnp.float32)        # layer_norm.bias

    emb_out, mask = embedding_layer_forward(
        bert_embeddings, w_proj, b_proj, pos_emb, gamma, beta)
    emb_out = jax.block_until_ready(emb_out)
    mask = jax.block_until_ready(mask)

    ref = _reference(bert_embeddings, w_proj, b_proj, pos_emb, gamma, beta)
    assert emb_out.shape == (B, S, D)
    assert mask.shape == (B, S)
    assert jnp.allclose(emb_out, ref, atol=1e-4, rtol=1e-4)

    # Also exercise the lane-dense two-output mode and check it against the same reference.
    (outc, outp), mask2 = embedding_layer_forward(
        bert_embeddings, w_proj, b_proj, pos_emb, gamma, beta, split_output=True)
    outc = jax.block_until_ready(outc)
    outp = jax.block_until_ready(outp)
    assert jnp.allclose(jnp.concatenate([outc, outp], axis=-1), ref, atol=1e-4, rtol=1e-4)
    assert mask2.shape == (B, S)

    print("KERNEL_OK")
</pallas_src>

<mosaic_0001>
module attributes {stable_mosaic.version = 11 : i64} {
  func.func @kernel(%arg0: i32, %arg1: i32, %arg2: memref<1x8x32xf32, #tpu.memory_space<vmem>>, %arg3: memref<32x16xf32, #tpu.memory_space<vmem>>, %arg4: memref<8x16xf32, #tpu.memory_space<vmem>>, %arg5: memref<8x16xf32, #tpu.memory_space<vmem>>, %arg6: memref<8x16xf32, #tpu.memory_space<vmem>>, %arg7: memref<1x8x32xf32, #tpu.memory_space<vmem>>) attributes {dimension_semantics = [#tpu.dimension_semantics<parallel>, #tpu.dimension_semantics<parallel>], iteration_bounds = array<i64: 1, 2>, scalar_prefetch = 0 : i64, scratch_operands = 0 : i64, tpu.core_type = #tpu.core_type<tc>, window_params = [{transform_indices = @transform_0, window_bounds = array<i64: 1, 8, 32>}, {pipeline_mode = #tpu.pipeline_mode<synchronous>, transform_indices = @transform_1, window_bounds = array<i64: 32, 16>}, {pipeline_mode = #tpu.pipeline_mode<synchronous>, transform_indices = @transform_2, window_bounds = array<i64: 8, 16>}, {pipeline_mode = #tpu.pipeline_mode<synchronous>, transform_indices = @transform_3, window_bounds = array<i64: 8, 16>}, {transform_indices = @transform_4, window_bounds = array<i64: 8, 16>}, {transform_indices = @transform_5, window_bounds = array<i64: 1, 8, 32>}]} {
    %c0 = arith.constant 0 : index
    %c0_0 = arith.constant 0 : index
    %c0_1 = arith.constant 0 : index
    %0 = vector.load %arg2[%c0, %c0_0, %c0_1] : memref<1x8x32xf32, #tpu.memory_space<vmem>>, vector<1x8x32xf32>
    %1 = vector.shape_cast %0 : vector<1x8x32xf32> to vector<8x32xf32>
    %c0_2 = arith.constant 0 : index
    %c0_3 = arith.constant 0 : index
    %2 = vector.load %arg3[%c0_2, %c0_3] : memref<32x16xf32, #tpu.memory_space<vmem>>, vector<32x16xf32>
    %cst = arith.constant dense<0.000000e+00> : vector<8x16xf32>
    %3 = tpu.matmul %1, %2, %cst {dimension_numbers = #tpu.dot_dimension_numbers<[1], [0], [0], [1], [0, 0, 1, 1], [], []>} : vector<8x32xf32>, vector<32x16xf32>, vector<8x16xf32> -> vector<8x16xf32>
    %c0_4 = arith.constant 0 : index
    %c0_5 = arith.constant 0 : index
    %4 = vector.load %arg4[%c0_4, %c0_5] : memref<8x16xf32, #tpu.memory_space<vmem>>, vector<1x16xf32>
    %5 = vector.broadcast %4 : vector<1x16xf32> to vector<8x16xf32>
    %6 = arith.addf %3, %5 : vector<8x16xf32>
    %c0_6 = arith.constant 0 : index
    %c0_7 = arith.constant 0 : index
    %7 = vector.load %arg6[%c0_6, %c0_7] : memref<8x16xf32, #tpu.memory_space<vmem>>, vector<8x16xf32>
    %cst_8 = arith.constant dense<0.000000e+00> : vector<8xf32>
    %8 = vector.multi_reduction <add>, %6, %cst_8 [1] : vector<8x16xf32> to vector<8xf32>
    %9 = vector.shape_cast %8 : vector<8xf32> to vector<8x1xf32>
    %cst_9 = arith.constant dense<0.000000e+00> : vector<8xf32>
    %10 = vector.multi_reduction <add>, %7, %cst_9 [1] : vector<8x16xf32> to vector<8xf32>
    %11 = vector.shape_cast %10 : vector<8xf32> to vector<8x1xf32>
    %12 = arith.addf %9, %11 : vector<8x1xf32>
    %cst_10 = arith.constant 3.125000e-02 : f32
    %13 = vector.broadcast %cst_10 : f32 to vector<8x1xf32>
    %14 = arith.mulf %12, %13 : vector<8x1xf32>
    %15 = vector.broadcast %14 : vector<8x1xf32> to vector<8x16xf32>
    %16 = arith.subf %6, %15 : vector<8x16xf32>
    %17 = vector.broadcast %14 : vector<8x1xf32> to vector<8x16xf32>
    %18 = arith.subf %7, %17 : vector<8x16xf32>
    %19 = arith.mulf %16, %16 : vector<8x16xf32>
    %cst_11 = arith.constant dense<0.000000e+00> : vector<8xf32>
    %20 = vector.multi_reduction <add>, %19, %cst_11 [1] : vector<8x16xf32> to vector<8xf32>
    %21 = vector.shape_cast %20 : vector<8xf32> to vector<8x1xf32>
    %22 = arith.mulf %18, %18 : vector<8x16xf32>
    %cst_12 = arith.constant dense<0.000000e+00> : vector<8xf32>
    %23 = vector.multi_reduction <add>, %22, %cst_12 [1] : vector<8x16xf32> to vector<8xf32>
    %24 = vector.shape_cast %23 : vector<8xf32> to vector<8x1xf32>
    %25 = arith.addf %21, %24 : vector<8x1xf32>
    %cst_13 = arith.constant 3.125000e-02 : f32
    %26 = vector.broadcast %cst_13 : f32 to vector<8x1xf32>
    %27 = arith.mulf %25, %26 : vector<8x1xf32>
    %cst_14 = arith.constant 9.99999974E-6 : f32
    %28 = vector.broadcast %cst_14 : f32 to vector<8x1xf32>
    %29 = arith.addf %27, %28 : vector<8x1xf32>
    %30 = math.rsqrt %29 : vector<8x1xf32>
    %31 = vector.broadcast %30 : vector<8x1xf32> to vector<8x16xf32>
    %32 = arith.mulf %16, %31 : vector<8x16xf32>
    %c1 = arith.constant 1 : index
    %c0_15 = arith.constant 0 : index
    %33 = vector.load %arg4[%c1, %c0_15] : memref<8x16xf32, #tpu.memory_space<vmem>>, vector<1x16xf32>
    %34 = vector.broadcast %33 : vector<1x16xf32> to vector<8x16xf32>
    %35 = arith.mulf %32, %34 : vector<8x16xf32>
    %c2 = arith.constant 2 : index
    %c0_16 = arith.constant 0 : index
    %36 = vector.load %arg4[%c2, %c0_16] : memref<8x16xf32, #tpu.memory_space<vmem>>, vector<1x16xf32>
    %37 = vector.broadcast %36 : vector<1x16xf32> to vector<8x16xf32>
    %38 = arith.addf %35, %37 : vector<8x16xf32>
    %39 = vector.broadcast %30 : vector<8x1xf32> to vector<8x16xf32>
    %40 = arith.mulf %18, %39 : vector<8x16xf32>
    %c0_17 = arith.constant 0 : index
    %c0_18 = arith.constant 0 : index
    %41 = vector.load %arg5[%c0_17, %c0_18] : memref<8x16xf32, #tpu.memory_space<vmem>>, vector<1x16xf32>
    %42 = vector.broadcast %41 : vector<1x16xf32> to vector<8x16xf32>
    %43 = arith.mulf %40, %42 : vector<8x16xf32>
    %c1_19 = arith.constant 1 : index
    %c0_20 = arith.constant 0 : index
    %44 = vector.load %arg5[%c1_19, %c0_20] : memref<8x16xf32, #tpu.memory_space<vmem>>, vector<1x16xf32>
    %45 = vector.broadcast %44 : vector<1x16xf32> to vector<8x16xf32>
    %46 = arith.addf %43, %45 : vector<8x16xf32>
    %c0_21 = arith.constant 0 : index
    %c0_22 = arith.constant 0 : index
    %c0_23 = arith.constant 0 : index
    %47 = vector.load %arg7[%c0_21, %c0_22, %c0_23] : memref<1x8x32xf32, #tpu.memory_space<vmem>>, vector<1x8x16xf32>
    %48 = vector.shape_cast %47 : vector<1x8x16xf32> to vector<8x16xf32>
    %49 = vector.shape_cast %38 : vector<8x16xf32> to vector<1x8x16xf32>
    tpu.vector_store %arg7[%c0_21, %c0_22, %c0_23], %49 {strides = array<i32>} : memref<1x8x32xf32, #tpu.memory_space<vmem>>, vector<1x8x16xf32>,
    %c0_24 = arith.constant 0 : index
    %c0_25 = arith.constant 0 : index
    %c16 = arith.constant 16 : index
    %50 = vector.load %arg7[%c0_24, %c0_25, %c16] : memref<1x8x32xf32, #tpu.memory_space<vmem>>, vector<1x8x16xf32>
    %51 = vector.shape_cast %50 : vector<1x8x16xf32> to vector<8x16xf32>
    %52 = vector.shape_cast %46 : vector<8x16xf32> to vector<1x8x16xf32>
    tpu.vector_store %arg7[%c0_24, %c0_25, %c16], %52 {strides = array<i32>} : memref<1x8x32xf32, #tpu.memory_space<vmem>>, vector<1x8x16xf32>,
    return
  }
  func.func @transform_0(%arg0: i32, %arg1: i32) -> (i32, i32, i32) {
    %c0_i32 = arith.constant 0 : i32
    %c0_i32_0 = arith.constant 0 : i32
    return %arg1, %arg0, %c0_i32 : i32, i32, i32
  }
  func.func @transform_1(%arg0: i32, %arg1: i32) -> (i32, i32) {
    %c0_i32 = arith.constant 0 : i32
    %c0_i32_0 = arith.constant 0 : i32
    %c0_i32_1 = arith.constant 0 : i32
    return %c0_i32, %c0_i32_0 : i32, i32
  }
  func.func @transform_2(%arg0: i32, %arg1: i32) -> (i32, i32) {
    %c0_i32 = arith.constant 0 : i32
    %c0_i32_0 = arith.constant 0 : i32
    %c0_i32_1 = arith.constant 0 : i32
    return %c0_i32, %c0_i32_0 : i32, i32
  }
  func.func @transform_3(%arg0: i32, %arg1: i32) -> (i32, i32) {
    %c0_i32 = arith.constant 0 : i32
    %c0_i32_0 = arith.constant 0 : i32
    %c0_i32_1 = arith.constant 0 : i32
    return %c0_i32, %c0_i32_0 : i32, i32
  }
  func.func @transform_4(%arg0: i32, %arg1: i32) -> (i32, i32) {
    %c0_i32 = arith.constant 0 : i32
    %c0_i32_0 = arith.constant 0 : i32
    return %arg0, %c0_i32 : i32, i32
  }
  func.func @transform_5(%arg0: i32, %arg1: i32) -> (i32, i32, i32) {
    %c0_i32 = arith.constant 0 : i32
    %c0_i32_0 = arith.constant 0 : i32
    return %arg1, %arg0, %c0_i32 : i32, i32, i32
  }
}

</mosaic_0001>

<bundles_post_ra>
// kernel: tpu_custom_call.1
= control target key start
LH: loop header
LB: loop body
LE: loop exit
PB: predicated region body
PF: predicated region fallthrough
CT: control target
= control target key end

     0   :  { %10 = vsyncpa [#allocation3], 0  ;;  %s850_s0 = inlined_call_operand.vmem [shape: f32[2,8,32], index: 0, kind: input, shape index: {}]   ;;  %s851_s1 = inlined_call_operand.vmem [shape: f32[32,16], index: 1, kind: input, shape index: {}]   ;;  %s852_s2 = inlined_call_operand.vmem [shape: f32[8,16], index: 2, kind: input, shape index: {}]   ;;  %s853_s3 = inlined_call_operand.vmem [shape: f32[8,16], index: 3, kind: input, shape index: {}]   ;;  %s854_s4 = inlined_call_operand.vmem [shape: f32[8,16], index: 4, kind: input, shape index: {}]   ;;  %s855_s5 = inlined_call_operand.hbm [shape: f32[2,8,32], index: 5, kind: output, shape index: {}]  }
   0x1   :  { %12 = vsyncpa [#allocation3 + $0x1], 0  ;;  %s710_s18 = smov 0   ;;  %s712_s19 = smov 0  }
   0x2   :  { %s714_s20 = smov 0   ;;  %s716_s21 = smov 0  }
   0x3   :  { %s718_s22 = smov 0   ;;  %s720_s23 = smov 0  }
   0x4 LB: > { %s504_s24 = sadd.s32 4294967295, %s674_s23   ;;  %s505_s25 = sadd.s32 4294967294, %s674_s23   ;;  %s674_s23 = sphi %s720_s23, %s18_s23   ;;  %s670_s22 = sphi %s718_s22, %s862_s22   ;;  %s666_s21 = sphi %s716_s21, %s861_s21   ;;  %s662_s20 = sphi %s714_s20, %s860_s20   ;;  %s658_s19 = sphi %s712_s19, %s859_s19   ;;  %s654_s18 = sphi %s710_s18, %s858_s18  }
   0x5   : > { %s27_s26 = sadd.s32 1, %s670_s22  ;;  %s156_s27 = sadd.s32 1, %s662_s20 }
   0x6   : > { %p28_p0 = scmp.ge.s32.totalorder %s27_s26, 2  ;;  %p166_p1 = scmp.ne.s32.totalorder %s662_s20, %s658_s19 }
   0x7   : > { %p167_p2 = scmp.eq.s32.totalorder %s504_s24, 1  ;;  %p172_p3 = scmp.ne.s32.totalorder %s658_s19, %s654_s18 }
   0x8   : > { %s864_s26 = smov (%p28_p0, %s27_s26), 0  ;;  %p173_p5 = scmp.eq.s32.totalorder %s505_s25, 1 }
   0x9   : > { %p750_p4 = por %p167_p2, %p166_p1  ;;  %s151_s29 = ssub.s32 %s670_s22, %s864_s26 }
   0xa   : > { %p509_p6 = scmp.ge.s32.totalorder %s674_s23, 1  ;;  %p154_p7 = scmp.eq.s32.totalorder %s151_s29, 0 }
   0xb   : > { %p757_p8 = por %p173_p5, %p172_p3  ;;  %p217_p9 = scmp.lt.s32.totalorder %s674_s23, 3 }
   0xc   : > { %s763_s6 = scalar_select %p154_p7, %s662_s20, %s156_s27  }
   0xd   : > { %p218_p10 = pnand %p509_p6, %p217_p9 }
   0xe   : > { %p251_p11 = scmp.lt.s32.totalorder (!%p218_p10), %s666_s21, 1  ;;  %s248_s9 = sand.u32 (!%p218_p10), 1, %s658_s19  }
   0xf   : > { %221 = sbr.rel (%p218_p10) target bundleno = 672 (0x2a0), region = 40  ;;  %s519_s29 = sshll.u32 (!%p218_p10), %s666_s21, 7 }
  0x10   : > { %s404_s12 = scalar_lea.sflag (!%p218_p10), [#allocation3], %s248_s9 }
  0x14   : > { %v266_v0 = vld [vmem:[%s851_s1 + $0x18] sm:$0xff]  ;;  %v676_v1 = vmov 0.0   ;;  %v265_v2 = vld [vmem:[%s851_s1 + $0x10] sm:$0xff]  ;;  %vm677_vm0 = vmmov 0   ;;  %s252_s11 = scalar_select %p251_p11, %s666_s21, 1  ;;  %v264_v3 = vld [vmem:[%s851_s1 + $0x8] sm:$0xff] }
  0x15   : > { %527 = vmatprep.subr.mxu0 %v676_v1  ;;  %535 = vmatprep.mubr.msk.f32.mxu0 %vm677_vm0, %v676_v1  ;;  %v263_v4 = vld [vmem:[%s851_s1] sm:$0xff]  ;;  %vm272_vm1 = vcmask 261120   ;;  %vm347_vm2 = vcmask 130048   ;;  %vm401_vm3 = vcmask 261248  }
  0x16   : > { %528 = vmatpush3.msra.mxu0 %v266_v0  ;;  %s511_s14 = sshll.u32 %s252_s11, 3  ;;  %v512_v6 = vld [vmem:[%s852_s2] ss:$0 sm:$0xff]  ;;  %v514_v30 = vld [vmem:[%s852_s2 + $0x1] ss:$0 sm:$0xff]  ;;  %s810_s11 = scalar_lea.hbm %s855_s5, %s519_s29 }
  0x17   : > { %529 = vmatprep.subr.mxu0 %v676_v1  ;;  %s257_s25 = scalar_lea.vmem %s850_s0, %s511_s14  ;;  %v346_v10 = vld [vmem:[%s854_s4] sm:$0xff]  ;;  %s510_s14 = sshll.u32 %s248_s9, 3 }
  0x18   : > { %530 = vmatpush3.msra.mxu0 %v265_v2  ;;  %v262_v5 = vld [vmem:[%s257_s25] sm:$0xff]  ;;  %v351_v12 = vsel %vm347_vm2, %v346_v10, 0.0  ;;  %s678_s25 = smov 16   ;;  %s250_s27 = scalar_lea.vmem [#allocation2], %s510_s14 }
  0x19   : > { %531 = vmatprep.subr.mxu0 %v676_v1  ;;  %v516_v29 = vld [vmem:[%s853_s3] ss:$0 sm:$0xff]  ;;  %v517_v33 = vld [vmem:[%s853_s3 + $0x1] ss:$0 sm:$0xff]  ;;  %v515_v34 = vld [vmem:[%s852_s2 + $0x2] ss:$0 sm:$0xff] }
  0x1a   : > { %532 = vmatpush3.msra.mxu0 %v264_v3  ;;  %s418_s7 = sshll.u32 %s250_s27, 4  ;;  %s679_s14 = smov [#allocation2]   ;;  %s419_s7 = int_to_ptr.vmem [resolvable:$true] %s418_s7 }
  0x1b   : > { %533 = vmatprep.subr.mxu0 %v676_v1  ;;  %s598_s13 = scalar_lea.vmem %s419_s7, 128  ;;  %s602_s15 = sshll.u32 %s679_s14, 4  ;;  %s603_s15 = int_to_ptr.vmem [resolvable:$false] %s602_s15 }
  0x1c   : > { %534 = vmatpush3.msra.mxu0 %v263_v4  ;;  %p599_p12 = scmp.ne.s32.totalorder %s419_s7, %s598_s13  ;;  %s604_s21 = scalar_lea.vmem %s603_s15, 256 }
  0x1d   : > { %536 = vmatmul.mubr.msk.f32.vlgmr.msra.gmra.mxu0 %vm272_vm1, %v262_v5  ;;  %p605_p1 = scmp.lt.s32.totalorder %s419_s7, %s603_s15  ;;  %p606_p2 = scmp.lt.s32.totalorder %s604_s21, %s598_s13 }
  0x1e   : > { %p600_p13 = pnand %p599_p12, %p750_p4 }
  0x1f   : > { %p607_p3 = por %p606_p2, %p605_p1 }
  0x20   : > { %p601_p0 = pneg %p600_p13 }
  0x22   : > { %p608_p5 = pnand %p607_p3, %p601_p0 }
  0xdd   : > { %v342_v7 = vpop.f32.mrf.mxu0 }
  0xde   : > { %v343_v8 = vadd.f32 %v512_v6, %v342_v7 }
  0xdf   : > { %v537_v9 = vpop.f32.mrf.mxu0 }
  0xe0   : > { %v348_v11 = vsel %vm347_vm2, %v343_v8, 0.0 }
  0xe1   : > { %349 = vadd.xlane.f32.xlu0 %v348_v11 }
  0xe5   : > { %352 = vadd.xlane.f32.xlu0 %v351_v12 }
 0x16a   : > { %v350_v13 = vpop.xlane.xlu0 %349 }
 0x16e   : > { %v353_v14 = vpop.xlane.xlu0 %352 }
 0x16f   : > { %v354_v15 = vadd.f32 %v353_v14, %v350_v13 }
 0x171   : > { %v355_v16 = vmul.f32 0.03125, %v354_v15 }
 0x173   : > { %v356_v17 = vsub.f32 %v343_v8, %v355_v16  ;;  %v357_v18 = vsub.f32 %v346_v10, %v355_v16 }
 0x175   : > { %v358_v19 = vmul.f32 %v356_v17, %v356_v17  ;;  %v362_v21 = vmul.f32 %v357_v18, %v357_v18 }
 0x177   : > { %v359_v20 = vsel %vm347_vm2, %v358_v19, 0.0  ;;  %v363_v22 = vsel %vm347_vm2, %v362_v21, 0.0 }
 0x178   : > { %360 = vadd.xlane.f32.xlu1 %v359_v20 }
 0x17c   : > { %364 = vadd.xlane.f32.xlu1 %v363_v22 }
 0x201   : > { %v361_v23 = vpop.xlane.xlu1 %360 }
 0x205   : > { %v365_v24 = vpop.xlane.xlu1 %364 }
 0x206   : > { %v366_v25 = vadd.f32 %v365_v24, %v361_v23 }
 0x208   : > { %v367_v26 = vmul.f32 0.03125, %v366_v25 }
 0x20a   : > { %v368_v27 = vadd.f32 1e-05, %v367_v26 }
 0x20c   : > { %596 = vrsqrt.f32 %v368_v27 }
 0x219   : > { %v597_v28 = vpop.eup %596 }
 0x21a   : > { %v383_v31 = vmul.f32 %v597_v28, %v357_v18  ;;  %v370_v32 = vmul.f32 %v597_v28, %v356_v17 }
 0x21c   : > { %v389_v35 = vmul.f32 %v516_v29, %v383_v31  ;;  %v376_v36 = vmul.f32 %v514_v30, %v370_v32 }
 0x21e   : > { %v395_v37 = vadd.f32 %v517_v33, %v389_v35  ;;  %v382_v38 = vadd.f32 %v515_v34, %v376_v36 }
 0x220   : > { %398 = vrot.lane.b32.xlu0 %v395_v37, %s678_s25  ;;  %396 = vst.msk [vmem:[%s250_s27] sm:$0xff] %vm347_vm2, %v382_v38 }
 0x292   : > { %v399_v39 = vpop.permute.xlu0 %398 }
 0x293   : > { %402 = vst.msk [vmem:[%s250_s27] sm:$0xff] %vm401_vm3, %v399_v39 }
 0x294   : > { %611 = shalt.err (!%p608_p5)
}
 0x295   : > { %s612_s16 = scalar_lea.hbm %s810_s11, 128  ;;  %s616_s24 = scalar_lea.hbm %s855_s5, 256 }
 0x296   : > { %p613_p6 = scmp.ne.s32.totalorder %s810_s11, %s612_s16  ;;  %p617_p10 = scmp.lt.s32.totalorder %s810_s11, %s855_s5 }
 0x297   : > { %p618_p11 = scmp.lt.s32.totalorder %s616_s24, %s612_s16 }
 0x298   : > { %p614_p7 = pnand %p613_p6, %p750_p4 }
 0x299   : > { %p619_p12 = por %p618_p11, %p617_p10 }
 0x29a   : > { %p615_p9 = pneg %p614_p7 }
 0x29c   : > { %p620_p13 = pnand %p619_p12, %p615_p9 }
 0x29e   : > { %623 = shalt.err (!%p620_p13)
}
 0x29f   : > { %538 = dma.vmem_to_hbm [thread:$0]  (%p750_p4), %s419_s7, 128, %s810_s11, %s404_s12  }
 0x2a0 PF: > { %p544_p0 = scmp.ge.s32.totalorder %s674_s23, 2  ;;  %s430_s29 = sand.u32 1, %s654_s18  }
 0x2a1   : > { %s431_s8 = scalar_lea.sflag [#allocation3], %s430_s29 }
 0x2a2   : > { %p541_p1 = pnand %p544_p0, %p757_p8 }
 0x2a4   : > { %p542_p2 = pneg %p541_p1 }
 0x2a6   : > { %649 = dma.done.wait (%p542_p2), %s431_s8, 128  }
 0x2a7   : > { %651 = vsyncadd (%p542_p2), %s431_s8, 4294967168  ;;  %s18_s23 = sadd.s32 1, %s674_s23   ;;  %s858_s18 = smov %s658_s19 }
 0x2a8   : > { %p15_p3 = scmp.ge.s32.totalorder %s18_s23, 4   ;;  %s859_s19 = smov %s662_s20 }
 0x2a9   : > { %s860_s20 = smov %s763_s6  ;;  %s861_s21 = smov %s670_s22 }
 0x2aa   : > { %s862_s22 = smov %s864_s26  ;;  %17 = sbr.rel (!%p15_p3) target bundleno = 4 (0x4), region = 78 }
 0x2af   :  { %436 = vsyncpa [#allocation3], 1 }
 0x2b0   :  { %438 = vsyncpa [#allocation3 + $0x1], 1 }

</bundles_post_ra>
